<compile_context>
chip_gen: v7x
topology: tpu7x:2x2x1
jax: 0.10.0
libtpu: 0.0.40
codegen_flags: <defaults>
</compile_context>

<pallas_src>
import jax
import jax.numpy as jnp
from jax.experimental import pallas as pl
from jax.experimental.pallas import tpu as pltpu

HIDDEN = 256  # fixed by the module definition (conv1x1_block -> 256 -> out)


def _bottleneck_kernel(x_ref, w1_ref, b1_ref, w2_ref, b2_ref, o_ref):
    # x_ref: (C_in, T) — channels on sublanes, pixels on lanes.
    x = x_ref[...]
    if x.dtype != jnp.bfloat16:
        x = x.astype(jnp.bfloat16)  # MXU is bf16-native on v5e/v6e/v7x

    # Layer 1: 1x1 conv (BN scale pre-folded into W1) + bias + ReLU. f32 acc.
    h = jnp.dot(w1_ref[...], x, preferred_element_type=jnp.float32)   # (HIDDEN, T)
    h = jnp.maximum(h + b1_ref[...], 0.0)
    # Narrow the (256, T) intermediate before it round-trips VMEM / feeds the
    # second MXU pass (halves vld/vst traffic for h).
    h = h.astype(jnp.bfloat16)

    # Layer 2: 1x1 conv (BN scale pre-folded into W2) + bias + ReLU. f32 acc.
    z = jnp.dot(w2_ref[...], h, preferred_element_type=jnp.float32)   # (C_out, T)
    z = jnp.maximum(z + b2_ref[...], 0.0)

    o_ref[...] = z.astype(o_ref.dtype)


def fold_params(raw_params, eps=1e-5):
    """Fold eval-mode BatchNorm into the conv weights.

    Conv weights are expected in PyTorch Conv2d layout: (out_ch, in_ch, 1, 1)
    (or already-squeezed (out_ch, in_ch)). Weights are stored as bf16 (MXU
    operands); biases stay f32. One-time host-side op.
    """
    w1, g1, be1, mu1, var1, w2, g2, be2, mu2, var2 = raw_params
    w1 = w1.reshape(w1.shape[0], -1)               # (HIDDEN, C_in)
    w2 = w2.reshape(w2.shape[0], -1)               # (C_out, HIDDEN)
    s1 = g1 / jnp.sqrt(var1 + eps)
    s2 = g2 / jnp.sqrt(var2 + eps)
    w1f = (w1 * s1[:, None]).astype(jnp.bfloat16)              # (HIDDEN, C_in)
    b1c = (be1 - mu1 * s1).reshape(-1, 1).astype(jnp.float32)  # (HIDDEN, 1)
    w2f = (w2 * s2[:, None]).astype(jnp.bfloat16)              # (C_out, HIDDEN)
    b2c = (be2 - mu2 * s2).reshape(-1, 1).astype(jnp.float32)  # (C_out, 1)
    return w1f, b1c, w2f, b2c


def _round_down(x, m):
    return (x // m) * m


def _choose_tile_hw(HW, N, tile_hw):
    # Whole image plane if it fits (full-extent block is always legal), else a
    # multiple of 256 (MXU-friendly on v6e/v7x).
    t = HW if HW <= tile_hw else max(256, _round_down(tile_hw, 256))
    # v7x has 2 TensorCores: with batch 1, make sure the grid has >= 2 steps so
    # both cores get work (no effect on v5e/v6e correctness or perf).
    if N == 1 and HW >= 512:
        t = min(t, max(256, _round_down(HW // 2, 256)))
    return t


def _vmem_budget_bytes(C_in, C_out, t, io_itemsize):
    x_tiles = 2 * C_in * t * io_itemsize            # double-buffered input tiles
    o_tiles = 2 * C_out * t * io_itemsize           # double-buffered output tiles
    weights = (HIDDEN * C_in + HIDDEN * C_out) * 2 + (HIDDEN + C_out) * 4  # single-buffered
    work = (HIDDEN + C_out) * t * 4 + HIDDEN * t * 2  # f32 h/z + bf16 h working set
    return x_tiles + o_tiles + weights + work


def bottleneck_pallas(x_nchw, folded_params, *, tile_hw=2048):
    """x_nchw: (N, C_in, H, W) float32 or bfloat16. Returns (N, C_out, H, W)."""
    w1f, b1, w2f, b2 = folded_params
    N, C_in, H, W = x_nchw.shape
    C_out = w2f.shape[0]
    HW = H * W

    # NCHW -> (N, C, H*W): contiguous reshape, no HBM copy, no transpose.
    x3d = x_nchw.reshape(N, C_in, HW)

    t = _choose_tile_hw(HW, N, tile_hw)
    grid = (N, pl.cdiv(HW, t))

    itemsize = x_nchw.dtype.itemsize
    flops = 2 * N * HW * (C_in * HIDDEN + HIDDEN * C_out)
    bytes_accessed = (N * HW * (C_in + C_out)) * itemsize \
        + (HIDDEN * C_in + HIDDEN * C_out) * 2 + (HIDDEN + C_out) * 4
    cost = pl.CostEstimate(flops=flops, transcendentals=0,
                           bytes_accessed=int(bytes_accessed))

    compiler_kwargs = dict(dimension_semantics=("parallel", "parallel"))
    budget = _vmem_budget_bytes(C_in, C_out, t, itemsize)
    if budget > int(0.8 * (32 << 20)):
        # Raise the scoped-VMEM limit only when big tiles / big channel counts
        # need it; cap at 64 MiB (v7x physical VMEM per TensorCore).
        compiler_kwargs["vmem_limit_bytes"] = min(int(budget * 1.25), 64 << 20)

    # Grid-invariant operands: single-buffer (constant index_map => no benefit
    # from double-buffering; frees VMEM for larger pixel tiles).
    const_spec = dict(pipeline_mode=pl.Buffered(1))

    out3d = pl.pallas_call(
        _bottleneck_kernel,
        out_shape=jax.ShapeDtypeStruct((N, C_out, HW), x_nchw.dtype),
        grid_spec=pltpu.PrefetchScalarGridSpec(
            num_scalar_prefetch=0,
            grid=grid,
            in_specs=[
                pl.BlockSpec((None, C_in, t), lambda n, j: (n, 0, j)),               # x tile
                pl.BlockSpec((HIDDEN, C_in), lambda n, j: (0, 0), **const_spec),      # W1 (BN-folded, bf16)
                pl.BlockSpec((HIDDEN, 1), lambda n, j: (0, 0), **const_spec),         # b1 (f32)
                pl.BlockSpec((C_out, HIDDEN), lambda n, j: (0, 0), **const_spec),     # W2 (BN-folded, bf16)
                pl.BlockSpec((C_out, 1), lambda n, j: (0, 0), **const_spec),          # b2 (f32)
            ],
            out_specs=pl.BlockSpec((None, C_out, t), lambda n, j: (n, 0, j)),
        ),
        compiler_params=pltpu.CompilerParams(**compiler_kwargs),
        cost_estimate=cost,
    )(x3d, w1f, b1, w2f, b2)

    return out3d.reshape(N, C_out, H, W)


def init_params(key, in_channels, out_channels):
    """Deterministic synthetic params in PyTorch layout:
    Conv2d weights (out_ch, in_ch, 1, 1) + BN affine/running stats (eval)."""
    ks = jax.random.split(key, 10)
    w1 = jax.random.normal(ks[0], (HIDDEN, in_channels, 1, 1), jnp.float32) * 0.1
    w2 = jax.random.normal(ks[1], (out_channels, HIDDEN, 1, 1), jnp.float32) * 0.05
    g1 = 1.0 + 0.1 * jax.random.normal(ks[2], (HIDDEN,), jnp.float32)
    be1 = 0.1 * jax.random.normal(ks[3], (HIDDEN,), jnp.float32)
    mu1 = 0.1 * jax.random.normal(ks[4], (HIDDEN,), jnp.float32)
    var1 = jnp.abs(jax.random.normal(ks[5], (HIDDEN,), jnp.float32)) + 0.5
    g2 = 1.0 + 0.1 * jax.random.normal(ks[6], (out_channels,), jnp.float32)
    be2 = 0.1 * jax.random.normal(ks[7], (out_channels,), jnp.float32)
    mu2 = 0.1 * jax.random.normal(ks[8], (out_channels,), jnp.float32)
    var2 = jnp.abs(jax.random.normal(ks[9], (out_channels,), jnp.float32)) + 0.5
    return (w1, g1, be1, mu1, var1, w2, g2, be2, mu2, var2)


def bottleneck_ref(x_nchw, raw_params, eps=1e-5):
    """Pure-JAX reference using UNFOLDED BN math (validates the fold too)."""
    w1, g1, be1, mu1, var1, w2, g2, be2, mu2, var2 = raw_params
    w1 = w1.reshape(w1.shape[0], -1)   # (HIDDEN, C_in)
    w2 = w2.reshape(w2.shape[0], -1)   # (C_out, HIDDEN)
    N, C_in, H, W = x_nchw.shape
    C_out = w2.shape[0]
    x2d = jnp.transpose(x_nchw, (0, 2, 3, 1)).reshape(-1, C_in)
    h = x2d @ w1.T
    h = (h - mu1) / jnp.sqrt(var1 + eps) * g1 + be1
    h = jnp.maximum(h, 0.0)
    z = h @ w2.T
    z = (z - mu2) / jnp.sqrt(var2 + eps) * g2 + be2
    z = jnp.maximum(z, 0.0)
    return jnp.transpose(z.reshape(N, H, W, C_out), (0, 3, 1, 2))


if __name__ == "__main__":
    key = jax.random.PRNGKey(0)
    k_x, k_p = jax.random.split(key)

    N, C_in, H, W = 2, 4, 16, 16
    C_out = 8

    x = jax.random.normal(k_x, (N, C_in, H, W), jnp.float32)
    raw = init_params(k_p, C_in, C_out)
    folded = fold_params(raw)

    out = jax.block_until_ready(bottleneck_pallas(x, folded))
    ref = bottleneck_ref(x, raw)

    assert out.shape == (N, C_out, H, W)
    # bf16 MXU operands with f32 accumulation: ~1e-2-level agreement expected.
    max_err = float(jnp.max(jnp.abs(out - ref)))
    assert jnp.allclose(out, ref, atol=3e-2, rtol=3e-2), max_err

    print("KERNEL_OK")
</pallas_src>

<mosaic_0001>
module attributes {stable_mosaic.version = 11 : i64} {
  func.func @_bottleneck_kernel(%arg0: i32, %arg1: i32, %arg2: memref<1x4x256xf32, #tpu.memory_space<vmem>>, %arg3: memref<256x4xbf16, #tpu.memory_space<vmem>>, %arg4: memref<256x1xf32, #tpu.memory_space<vmem>>, %arg5: memref<8x256xbf16, #tpu.memory_space<vmem>>, %arg6: memref<8x1xf32, #tpu.memory_space<vmem>>, %arg7: memref<1x8x256xf32, #tpu.memory_space<vmem>>) attributes {dimension_semantics = [#tpu.dimension_semantics<parallel>, #tpu.dimension_semantics<parallel>], iteration_bounds = array<i64: 2, 1>, scalar_prefetch = 0 : i64, scratch_operands = 0 : i64, tpu.core_type = #tpu.core_type<tc>, window_params = [{transform_indices = @transform_0, window_bounds = array<i64: 1, 4, 256>}, {pipeline_mode = #tpu.pipeline_mode<synchronous>, transform_indices = @transform_1, window_bounds = array<i64: 256, 4>}, {pipeline_mode = #tpu.pipeline_mode<synchronous>, transform_indices = @transform_2, window_bounds = array<i64: 256, 1>}, {pipeline_mode = #tpu.pipeline_mode<synchronous>, transform_indices = @transform_3, window_bounds = array<i64: 8, 256>}, {pipeline_mode = #tpu.pipeline_mode<synchronous>, transform_indices = @transform_4, window_bounds = array<i64: 8, 1>}, {transform_indices = @transform_5, window_bounds = array<i64: 1, 8, 256>}]} {
    %c0 = arith.constant 0 : index
    %c0_0 = arith.constant 0 : index
    %c0_1 = arith.constant 0 : index
    %0 = vector.load %arg2[%c0, %c0_0, %c0_1] : memref<1x4x256xf32, #tpu.memory_space<vmem>>, vector<1x4x256xf32>
    %1 = vector.shape_cast %0 : vector<1x4x256xf32> to vector<4x256xf32>
    %2 = arith.truncf %1 : vector<4x256xf32> to vector<4x256xbf16>
    %c0_2 = arith.constant 0 : index
    %c0_3 = arith.constant 0 : index
    %3 = vector.load %arg3[%c0_2, %c0_3] : memref<256x4xbf16, #tpu.memory_space<vmem>>, vector<256x4xbf16>
    %cst = arith.constant dense<0.000000e+00> : vector<256x256xf32>
    %4 = tpu.matmul %3, %2, %cst {dimension_numbers = #tpu.dot_dimension_numbers<[1], [0], [0], [1], [0, 0, 1, 1], [], []>} : vector<256x4xbf16>, vector<4x256xbf16>, vector<256x256xf32> -> vector<256x256xf32>
    %c0_4 = arith.constant 0 : index
    %c0_5 = arith.constant 0 : index
    %5 = vector.load %arg4[%c0_4, %c0_5] : memref<256x1xf32, #tpu.memory_space<vmem>>, vector<256x1xf32>
    %6 = vector.broadcast %5 : vector<256x1xf32> to vector<256x256xf32>
    %7 = arith.addf %4, %6 : vector<256x256xf32>
    %cst_6 = arith.constant 0.000000e+00 : f32
    %8 = vector.broadcast %cst_6 : f32 to vector<256x256xf32>
    %9 = arith.maximumf %7, %8 : vector<256x256xf32>
    %10 = arith.truncf %9 : vector<256x256xf32> to vector<256x256xbf16>
    %c0_7 = arith.constant 0 : index
    %c0_8 = arith.constant 0 : index
    %11 = vector.load %arg5[%c0_7, %c0_8] : memref<8x256xbf16, #tpu.memory_space<vmem>>, vector<8x256xbf16>
    %cst_9 = arith.constant dense<0.000000e+00> : vector<8x256xf32>
    %12 = tpu.matmul %11, %10, %cst_9 {dimension_numbers = #tpu.dot_dimension_numbers<[1], [0], [0], [1], [0, 0, 1, 1], [], []>} : vector<8x256xbf16>, vector<256x256xbf16>, vector<8x256xf32> -> vector<8x256xf32>
    %c0_10 = arith.constant 0 : index
    %c0_11 = arith.constant 0 : index
    %13 = vector.load %arg6[%c0_10, %c0_11] : memref<8x1xf32, #tpu.memory_space<vmem>>, vector<8x1xf32>
    %14 = vector.broadcast %13 : vector<8x1xf32> to vector<8x256xf32>
    %15 = arith.addf %12, %14 : vector<8x256xf32>
    %cst_12 = arith.constant 0.000000e+00 : f32
    %16 = vector.broadcast %cst_12 : f32 to vector<8x256xf32>
    %17 = arith.maximumf %15, %16 : vector<8x256xf32>
    %c0_13 = arith.constant 0 : index
    %c0_14 = arith.constant 0 : index
    %c0_15 = arith.constant 0 : index
    %18 = vector.load %arg7[%c0_13, %c0_14, %c0_15] : memref<1x8x256xf32, #tpu.memory_space<vmem>>, vector<1x8x256xf32>
    %19 = vector.shape_cast %18 : vector<1x8x256xf32> to vector<8x256xf32>
    %20 = vector.shape_cast %17 : vector<8x256xf32> to vector<1x8x256xf32>
    tpu.vector_store %arg7[%c0_13, %c0_14, %c0_15], %20 {strides = array<i32>} : memref<1x8x256xf32, #tpu.memory_space<vmem>>, vector<1x8x256xf32>,
    return
  }
  func.func @transform_0(%arg0: i32, %arg1: i32) -> (i32, i32, i32) {
    %c0_i32 = arith.constant 0 : i32
    %c0_i32_0 = arith.constant 0 : i32
    return %arg0, %c0_i32, %arg1 : i32, i32, i32
  }
  func.func @transform_1(%arg0: i32, %arg1: i32) -> (i32, i32) {
    %c0_i32 = arith.constant 0 : i32
    %c0_i32_0 = arith.constant 0 : i32
    %c0_i32_1 = arith.constant 0 : i32
    return %c0_i32, %c0_i32_0 : i32, i32
  }
  func.func @transform_2(%arg0: i32, %arg1: i32) -> (i32, i32) {
    %c0_i32 = arith.constant 0 : i32
    %c0_i32_0 = arith.constant 0 : i32
    %c0_i32_1 = arith.constant 0 : i32
    return %c0_i32, %c0_i32_0 : i32, i32
  }
  func.func @transform_3(%arg0: i32, %arg1: i32) -> (i32, i32) {
    %c0_i32 = arith.constant 0 : i32
    %c0_i32_0 = arith.constant 0 : i32
    %c0_i32_1 = arith.constant 0 : i32
    return %c0_i32, %c0_i32_0 : i32, i32
  }
  func.func @transform_4(%arg0: i32, %arg1: i32) -> (i32, i32) {
    %c0_i32 = arith.constant 0 : i32
    %c0_i32_0 = arith.constant 0 : i32
    %c0_i32_1 = arith.constant 0 : i32
    return %c0_i32, %c0_i32_0 : i32, i32
  }
  func.func @transform_5(%arg0: i32, %arg1: i32) -> (i32, i32, i32) {
    %c0_i32 = arith.constant 0 : i32
    %c0_i32_0 = arith.constant 0 : i32
    return %arg0, %c0_i32, %arg1 : i32, i32, i32
  }
}

</mosaic_0001>

<bundles_post_ra>
// kernel: tpu_custom_call.1
= control target key start
LH: loop header
LB: loop body
LE: loop exit
PB: predicated region body
PF: predicated region fallthrough
CT: control target
= control target key end

     0   :  { %10 = vsyncpa [#allocation3], 0  ;;  %s1603_s0 = inlined_call_operand.vmem [shape: f32[2,4,256], index: 0, kind: input, shape index: {}]   ;;  %s1604_s1 = inlined_call_operand.vmem [shape: bf16[256,4], index: 1, kind: input, shape index: {}]   ;;  %s1605_s2 = inlined_call_operand.vmem [shape: f32[256,1], index: 2, kind: input, shape index: {}]   ;;  %s1606_s3 = inlined_call_operand.vmem [shape: bf16[8,256], index: 3, kind: input, shape index: {}]   ;;  %s1607_s4 = inlined_call_operand.vmem [shape: f32[8,1], index: 4, kind: input, shape index: {}]   ;;  %s1608_s5 = inlined_call_operand.hbm [shape: f32[2,8,256], index: 5, kind: output, shape index: {}]  }
   0x1   :  { %12 = vsyncpa [#allocation3 + $0x1], 0  ;;  %s1301_s18 = smov 0   ;;  %s1303_s19 = smov 0  }
   0x2   :  { %s1305_s20 = smov 0   ;;  %s1307_s21 = smov 0  }
   0x3   :  { %s1309_s22 = smov 0   ;;  %s1311_s23 = smov 0  }
   0x4 LB: > { %s1062_s24 = sadd.s32 4294967295, %s1267_s23   ;;  %s1063_s25 = sadd.s32 4294967294, %s1267_s23   ;;  %s1267_s23 = sphi %s1311_s23, %s18_s23   ;;  %s1263_s22 = sphi %s1309_s22, %s1615_s22   ;;  %s1259_s21 = sphi %s1307_s21, %s1614_s21   ;;  %s1255_s20 = sphi %s1305_s20, %s1613_s20   ;;  %s1251_s19 = sphi %s1303_s19, %s1612_s19   ;;  %s1247_s18 = sphi %s1301_s18, %s1611_s18  }
   0x5   : > { %s30_s26 = sadd.s32 1, %s1263_s22  ;;  %s151_s27 = sadd.s32 1, %s1255_s20 }
   0x6   : > { %p32_p0 = scmp.ge.s32.totalorder %s30_s26, 2  ;;  %p161_p1 = scmp.ne.s32.totalorder %s1255_s20, %s1251_s19 }
   0x7   : > { %p162_p2 = scmp.eq.s32.totalorder %s1062_s24, 1  ;;  %p167_p3 = scmp.ne.s32.totalorder %s1251_s19, %s1247_s18 }
   0x8   : > { %s1617_s26 = smov (%p32_p0, %s30_s26), 0  ;;  %p168_p5 = scmp.eq.s32.totalorder %s1063_s25, 1 }
   0x9   : > { %p1341_p4 = por %p162_p2, %p161_p1  ;;  %s146_s29 = ssub.s32 %s1263_s22, %s1617_s26 }
   0xa   : > { %p1066_p6 = scmp.ge.s32.totalorder %s1267_s23, 1  ;;  %p149_p7 = scmp.eq.s32.totalorder %s146_s29, 0 }
   0xb   : > { %p1348_p8 = por %p168_p5, %p167_p3  ;;  %p211_p9 = scmp.lt.s32.totalorder %s1267_s23, 3 }
   0xc   : > { %s1354_s6 = scalar_select %p149_p7, %s1255_s20, %s151_s27  }
   0xd   : > { %p212_p10 = pnand %p1066_p6, %p211_p9 }
   0xe   : > { %p244_p11 = scmp.lt.s32.totalorder (!%p212_p10), %s1259_s21, 1  ;;  %v1269_v0 = vmov (!%p212_p10), 0   ;;  %vm614_vm0 = vcmask (!%p212_p10), 1041408   ;;  %v293_v6 = vld [vmem:[%s1605_s2] sm:$0xff] (!%p212_p10)  ;;  %vm565_vm1 = vcmask (!%p212_p10), 31744   ;;  %v294_v8 = vld [vmem:[%s1605_s2 + $0x8] sm:$0xff] (!%p212_p10) }
   0xf   : > { %215 = sbr.rel (%p212_p10) target bundleno = 611 (0x263), region = 40  ;;  %653 = vmatprep.mubr.bf16.mxu0 (!%p212_p10), %v1269_v0  ;;  %1168 = vset.pattern.permute.xlu0 (!%p212_p10), %v1269_v0  ;;  %v1171_v7 = vld [vmem:[%s1604_s1] sm:$0xff] (!%p212_p10)   ;;  %v295_v9 = vld [vmem:[%s1605_s2 + $0x10] sm:$0xff] (!%p212_p10)  ;;  %v296_v10 = vld [vmem:[%s1605_s2 + $0x18] sm:$0xff] (!%p212_p10)  ;;  %s1111_s9 = sshll.u32 (!%p212_p10), %s1259_s21, 8 }
  0x10   : > { %1169 = vset.pattern.permute.xlu1 (!%p212_p10), %v1269_v0  ;;  %327 = vperm.xlu0 (!%p212_p10), %1168, %v293_v6   ;;  %v297_v11 = vld [vmem:[%s1605_s2 + $0x20] sm:$0xff] (!%p212_p10)  ;;  %v298_v12 = vld [vmem:[%s1605_s2 + $0x28] sm:$0xff] (!%p212_p10)  ;;  %v299_v14 = vld [vmem:[%s1605_s2 + $0x30] sm:$0xff] (!%p212_p10)  ;;  %s1556_s14 = scalar_lea.hbm (!%p212_p10), %s1608_s5, %s1111_s9  ;;  %s1270_s16 = smov (!%p212_p10), [#allocation2]  }
  0x11   : > { %337 = vperm.xlu1 (!%p212_p10), %1169, %v295_v9   ;;  %v1172_v13 = vld [vmem:[%s1604_s1 + $0x8] sm:$0xff] (!%p212_p10)   ;;  %v300_v15 = vld [vmem:[%s1605_s2 + $0x38] sm:$0xff] (!%p212_p10)  ;;  %v301_v16 = vld [vmem:[%s1605_s2 + $0x40] sm:$0xff] (!%p212_p10)  ;;  %s1193_s17 = sshll.u32 (!%p212_p10), %s1270_s16, 4  ;;  %s1194_s17 = int_to_ptr.vmem [resolvable:$false] %s1193_s17 }
  0x12   : > { %v302_v17 = vld [vmem:[%s1605_s2 + $0x48] sm:$0xff] (!%p212_p10)  ;;  %v1173_v18 = vld [vmem:[%s1604_s1 + $0x10] sm:$0xff] (!%p212_p10)   ;;  %v304_v20 = vld [vmem:[%s1605_s2 + $0x58] sm:$0xff] (!%p212_p10)  ;;  %s1195_s24 = scalar_lea.vmem (!%p212_p10), %s1194_s17, 512 }
  0x13   : > { %v303_v19 = vld [vmem:[%s1605_s2 + $0x50] sm:$0xff] (!%p212_p10)  ;;  %v305_v21 = vld [vmem:[%s1605_s2 + $0x60] sm:$0xff] (!%p212_p10)  ;;  %v306_v22 = vld [vmem:[%s1605_s2 + $0x68] sm:$0xff] (!%p212_p10) }
  0x14   : > { %332 = vperm.xlu0 (!%p212_p10), %1168, %v294_v8   ;;  %v1174_v23 = vld [vmem:[%s1604_s1 + $0x18] sm:$0xff] (!%p212_p10)   ;;  %v307_v24 = vld [vmem:[%s1605_s2 + $0x70] sm:$0xff] (!%p212_p10)  ;;  %v309_v26 = vld [vmem:[%s1605_s2 + $0x80] sm:$0xff] (!%p212_p10) }
  0x15   : > { %342 = vperm.xlu1 (!%p212_p10), %1169, %v296_v10   ;;  %v308_v25 = vld [vmem:[%s1605_s2 + $0x78] sm:$0xff] (!%p212_p10)  ;;  %v310_v27 = vld [vmem:[%s1605_s2 + $0x88] sm:$0xff] (!%p212_p10)  ;;  %v1175_v28 = vld [vmem:[%s1604_s1 + $0x20] sm:$0xff] (!%p212_p10)  }
  0x16   : > { %s245_s7 = scalar_select %p244_p11, %s1259_s21, 1  ;;  %v311_v29 = vld [vmem:[%s1605_s2 + $0x90] sm:$0xff]  ;;  %v312_v30 = vld [vmem:[%s1605_s2 + $0x98] sm:$0xff]  ;;  %v313_v31 = vld [vmem:[%s1605_s2 + $0xa0] sm:$0xff] }
  0x17   : > { %v314_v32 = vld [vmem:[%s1605_s2 + $0xa8] sm:$0xff]  ;;  %v315_v34 = vld [vmem:[%s1605_s2 + $0xb0] sm:$0xff]  ;;  %v316_v35 = vld [vmem:[%s1605_s2 + $0xb8] sm:$0xff] }
  0x18   : > { %s1110_s8 = sshll.u32 %s245_s7, 3  ;;  %347 = vperm.xlu0 %1168, %v297_v11   ;;  %v1176_v33 = vld [vmem:[%s1604_s1 + $0x28] sm:$0xff]   ;;  %v317_v36 = vld [vmem:[%s1605_s2 + $0xc0] sm:$0xff]  ;;  %v1177_v38 = vld [vmem:[%s1604_s1 + $0x30] sm:$0xff]   ;;  %s240_s7 = sand.u32 1, %s1251_s19  }
  0x19   : > { %s251_s11 = scalar_lea.vmem %s1603_s0, %s1110_s8  ;;  %352 = vperm.xlu1 %1169, %v298_v12   ;;  %v318_v37 = vld [vmem:[%s1605_s2 + $0xc8] sm:$0xff]  ;;  %v319_v39 = vld [vmem:[%s1605_s2 + $0xd0] sm:$0xff]  ;;  %v320_v40 = vld [vmem:[%s1605_s2 + $0xd8] sm:$0xff]  ;;  %s1067_s8 = sshll.u32 %s240_s7, 4 }
  0x1a   : > { %v255_v1 = vld [vmem:[%s251_s11] sm:$0xff]  ;;  %v322_v42 = vld [vmem:[%s1605_s2 + $0xe8] sm:$0xff]  ;;  %v1178_v43 = vld [vmem:[%s1604_s1 + $0x38] sm:$0xff]   ;;  %s242_s10 = scalar_lea.vmem [#allocation2], %s1067_s8  ;;  %s970_s21 = scalar_lea.sflag [#allocation3], %s240_s7 }
  0x1b   : > { %v257_v2 = vcombine.high %v255_v1, %v255_v1  ;;  %v259_v3 = vpack.c.bf16 %v255_v1, %v255_v1  ;;  %v321_v41 = vld [vmem:[%s1605_s2 + $0xe0] sm:$0xff]  ;;  %v323_v44 = vld [vmem:[%s1605_s2 + $0xf0] sm:$0xff]  ;;  %v324_v45 = vld [vmem:[%s1605_s2 + $0xf8] sm:$0xff]  ;;  %s986_s11 = sshll.u32 %s242_s10, 4  ;;  %s1558_s11 = int_to_ptr.vmem [resolvable:$true] %s986_s11 }
  0x1c   : > { %357 = vperm.xlu0 %1168, %v299_v14   ;;  %v911_v46 = vld [vmem:[%s1607_s4] sm:$0xff]  ;;  %v1180_v48 = vld [vmem:[%s1604_s1 + $0x48] sm:$0xff]   ;;  %v1181_v49 = vld [vmem:[%s1604_s1 + $0x50] sm:$0xff]   ;;  %s1189_s15 = scalar_lea.vmem %s1558_s11, 256  ;;  %p1196_p1 = scmp.lt.s32.totalorder %s1558_s11, %s1194_s17 }
  0x1d   : > { %v260_v4 = vpack.c.bf16 %v257_v2, %v257_v2  ;;  %v616_v5 = vsel %vm614_vm0, %v259_v3, 0  ;;  %362 = vperm.xlu1 %1169, %v300_v15   ;;  %v1179_v47 = vld [vmem:[%s1604_s1 + $0x40] sm:$0xff]   ;;  %v1182_v50 = vld [vmem:[%s1604_s1 + $0x58] sm:$0xff]   ;;  %v1184_v52 = vld [vmem:[%s1604_s1 + $0x68] sm:$0xff]   ;;  %p1190_p12 = scmp.ne.s32.totalorder %s1558_s11, %s1189_s15  ;;  %p1197_p2 = scmp.lt.s32.totalorder %s1195_s24, %s1189_s15 }
  0x1e   : > { %v1183_v51 = vld [vmem:[%s1604_s1 + $0x60] sm:$0xff]   ;;  %v1185_v53 = vld [vmem:[%s1604_s1 + $0x70] sm:$0xff]   ;;  %v1186_v54 = vld [vmem:[%s1604_s1 + $0x78] sm:$0xff]  }
  0x1f   : > { %1086 = vmatprep.subr.msk.bf16.mxu0 %vm614_vm0, %v260_v4  ;;  %v1545_v62 = vld [vmem:[%s1606_s3] sm:$0xff]  ;;  %p1191_p13 = pnand %p1190_p12, %p1341_p4  ;;  %p1198_p3 = por %p1197_p2, %p1196_p1 }
  0x20   : > { %622 = vmatpush1.bf16.msra.mxu0 %v616_v5  ;;  %367 = vperm.xlu0 %1168, %v301_v16   ;;  %v1104_v1 = vcombine.high %v1545_v62, %v1545_v62 }
  0x21   : > { %372 = vperm.xlu1 %1169, %v302_v17   ;;  %p1192_p0 = pneg %p1191_p13 }
  0x22   : > { %956 = vmatprep.mubr.bf16.mxu1 %v1104_v1 }
  0x23   : > { %1087 = vmatmul.mubr.msk.bf16.vlgmr.msra.gmra.mrb[0].mxu0 %vm565_vm1, %v1171_v7  ;;  %p1199_p5 = pnand %p1198_p3, %p1192_p0 }
  0x24   : > { %663 = vmatprep.mubr.bf16.mxu0 %v1269_v0  ;;  %377 = vperm.xlu0 %1168, %v303_v19  }
  0x25   : > { %382 = vperm.xlu1 %1169, %v304_v20  }
  0x28   : > { %387 = vperm.xlu0 %1168, %v305_v21  }
  0x29   : > { %392 = vperm.xlu1 %1169, %v306_v22  }
  0x2b   : > { %1088 = vmatmul.mubr.msk.bf16.gmra.mrb[4].mxu0 %vm565_vm1, %v1172_v13 }
  0x2c   : > { %673 = vmatprep.mubr.bf16.mxu0 %v1269_v0  ;;  %397 = vperm.xlu0 %1168, %v307_v24  }
  0x2d   : > { %402 = vperm.xlu1 %1169, %v308_v25  }
  0x30   : > { %407 = vperm.xlu0 %1168, %v309_v26  }
  0x31   : > { %412 = vperm.xlu1 %1169, %v310_v27  }
  0x33   : > { %1089 = vmatmul.mubr.msk.bf16.gmra.mrb[8].mxu0 %vm565_vm1, %v1173_v18 }
  0x34   : > { %683 = vmatprep.mubr.bf16.mxu0 %v1269_v0  ;;  %417 = vperm.xlu0 %1168, %v311_v29  }
  0x35   : > { %422 = vperm.xlu1 %1169, %v312_v30  }
  0x38   : > { %427 = vperm.xlu0 %1168, %v313_v31  }
  0x39   : > { %432 = vperm.xlu1 %1169, %v314_v32  }
  0x3b   : > { %1090 = vmatmul.mubr.msk.bf16.gmra.mrb[12].mxu0 %vm565_vm1, %v1174_v23 }
  0x3c   : > { %693 = vmatprep.mubr.bf16.mxu0 %v1269_v0  ;;  %437 = vperm.xlu0 %1168, %v315_v34  }
  0x3d   : > { %442 = vperm.xlu1 %1169, %v316_v35  }
  0x40   : > { %447 = vperm.xlu0 %1168, %v317_v36  }
  0x41   : > { %452 = vperm.xlu1 %1169, %v318_v37  }
  0x43   : > { %1091 = vmatmul.mubr.msk.bf16.gmra.mrb[16].mxu0 %vm565_vm1, %v1175_v28 }
  0x44   : > { %703 = vmatprep.mubr.bf16.mxu0 %v1269_v0  ;;  %457 = vperm.xlu0 %1168, %v319_v39  }
  0x45   : > { %462 = vperm.xlu1 %1169, %v320_v40  }
  0x48   : > { %467 = vperm.xlu0 %1168, %v321_v41  }
  0x49   : > { %472 = vperm.xlu1 %1169, %v322_v42  }
  0x4b   : > { %1092 = vmatmul.mubr.msk.bf16.gmra.mrb[20].mxu0 %vm565_vm1, %v1176_v33 }
  0x4c   : > { %713 = vmatprep.mubr.bf16.mxu0 %v1269_v0  ;;  %477 = vperm.xlu0 %1168, %v323_v44  }
  0x4d   : > { %482 = vperm.xlu1 %1169, %v324_v45  }
  0x50   : > { %914 = vperm.xlu0 %1168, %v911_v46  }
  0x53   : > { %1093 = vmatmul.mubr.msk.bf16.gmra.mrb[24].mxu0 %vm565_vm1, %v1177_v38 }
  0x54   : > { %723 = vmatprep.mubr.bf16.mxu0 %v1269_v0 }
  0x5b   : > { %1094 = vmatmul.mubr.msk.bf16.gmra.mrb[28].mxu0 %vm565_vm1, %v1178_v43 }
  0x5c   : > { %733 = vmatprep.mubr.bf16.mxu0 %v1269_v0 }
  0x63   : > { %1095 = vmatmul.mubr.msk.bf16.gmra.mrb[32].mxu0 %vm565_vm1, %v1179_v47 }
  0x64   : > { %743 = vmatprep.mubr.bf16.mxu0 %v1269_v0 }
  0x6b   : > { %1096 = vmatmul.mubr.msk.bf16.gmra.mrb[36].mxu0 %vm565_vm1, %v1180_v48 }
  0x6c   : > { %753 = vmatprep.mubr.bf16.mxu0 %v1269_v0 }
  0x73   : > { %1097 = vmatmul.mubr.msk.bf16.gmra.mrb[40].mxu0 %vm565_vm1, %v1181_v49 }
  0x74   : > { %763 = vmatprep.mubr.bf16.mxu0 %v1269_v0 }
  0x7b   : > { %1098 = vmatmul.mubr.msk.bf16.gmra.mrb[44].mxu0 %vm565_vm1, %v1182_v50 }
  0x7c   : > { %773 = vmatprep.mubr.bf16.mxu0 %v1269_v0 }
  0x83   : > { %1099 = vmatmul.mubr.msk.bf16.gmra.mrb[48].mxu0 %vm565_vm1, %v1183_v51 }
  0x84   : > { %783 = vmatprep.mubr.bf16.mxu0 %v1269_v0 }
  0x8b   : > { %1100 = vmatmul.mubr.msk.bf16.gmra.mrb[52].mxu0 %vm565_vm1, %v1184_v52 }
  0x8c   : > { %793 = vmatprep.mubr.bf16.mxu0 %v1269_v0 }
  0x8f   : > { %v328_v55 = vpop.permute.xlu0 %327 }
  0x90   : > { %v338_v2 = vpop.permute.xlu1 %337 }
  0x93   : > { %1101 = vmatmul.mubr.msk.bf16.gmra.mrb[56].mxu0 %vm565_vm1, %v1185_v53  ;;  %v333_v59 = vpop.permute.xlu0 %332 }
  0x94   : > { %803 = vmatprep.mubr.bf16.mxu0 %v1269_v0  ;;  %v343_v13 = vpop.permute.xlu1 %342 }
  0x97   : > { %v348_v24 = vpop.permute.xlu0 %347 }
  0x98   : > { %v353_v29 = vpop.permute.xlu1 %352 }
  0x9b   : > { %1102 = vmatmul.mubr.msk.bf16.gmra.mrb[60].mxu0 %vm565_vm1, %v1186_v54  ;;  %v358_v40 = vpop.permute.xlu0 %357 }
  0x9c   : > { %v363_v45 = vpop.permute.xlu1 %362 }
  0xf6   : > { %v655_v56 = vpop.f32.mrb[0].mxu0 }
  0xf7   : > { %v656_v57 = vadd.f32 %v655_v56, %v328_v55  ;;  %v657_v58 = vpop.f32.mrb[1].mxu0  ;;  %v368_v56 = vpop.permute.xlu0 %367 }
  0xf8   : > { %v658_v60 = vadd.f32 %v657_v58, %v328_v55  ;;  %v659_v61 = vpop.f32.mrb[2].mxu0 }
  0xf9   : > { %v660_v63 = vadd.f32 %v659_v61, %v333_v59  ;;  %v661_v0 = vpop.f32.mrb[3].mxu0  ;;  %v814_v4 = vmax.f32 %v656_v57, 0.0  ;;  %v373_v61 = vpop.permute.xlu1 %372 }
  0xfa   : > { %v662_v3 = vadd.f32 %v661_v0, %v333_v59  ;;  %v815_v6 = vmax.f32 %v658_v60, 0.0 }
  0xfb   : > { %v816_v5 = vmax.f32 %v660_v63, 0.0 }
  0xfc   : > { %v817_v7 = vmax.f32 %v662_v3, 0.0 }
  0xfd   : > { %v878_v8 = vpack.c.bf16 %v816_v5, %v814_v4 }
  0xfe   : > { %v665_v9 = vpop.f32.mrb[4].mxu0  ;;  %v879_v10 = vpack.c.bf16 %v817_v7, %v815_v6 }
  0xff   : > { %v666_v11 = vadd.f32 %v665_v9, %v338_v2  ;;  %v667_v12 = vpop.f32.mrb[5].mxu0  ;;  %v378_v9 = vpop.permute.xlu0 %377 }
 0x100   : > { %v668_v14 = vadd.f32 %v667_v12, %v338_v2  ;;  %v669_v15 = vpop.f32.mrb[6].mxu0  ;;  %924 = vmatprep.subr.bf16.mxu1 %v879_v10 }
 0x101   : > { %v670_v16 = vadd.f32 %v669_v15, %v343_v13  ;;  %v671_v17 = vpop.f32.mrb[7].mxu0  ;;  %925 = vmatpush1.bf16.msra.mxu1 %v878_v8  ;;  %v818_v19 = vmax.f32 %v666_v11, 0.0 }
 0x102   : > { %v672_v18 = vadd.f32 %v671_v17, %v343_v13  ;;  %v819_v21 = vmax.f32 %v668_v14, 0.0  ;;  %v383_v14 = vpop.permute.xlu1 %382 }
 0x103   : > { %v820_v20 = vmax.f32 %v670_v16, 0.0 }
 0x104   : > { %v821_v22 = vmax.f32 %v672_v18, 0.0 }
 0x105   : > { %v880_v23 = vpack.c.bf16 %v820_v20, %v818_v19 }
 0x106   : > { %v881_v25 = vpack.c.bf16 %v821_v22, %v819_v21  ;;  %v675_v26 = vpop.f32.mrb[8].mxu0 }
 0x107   : > { %v676_v27 = vadd.f32 %v675_v26, %v348_v24  ;;  %v677_v28 = vpop.f32.mrb[9].mxu0 }
 0x108   : > { %v678_v30 = vadd.f32 %v677_v28, %v348_v24  ;;  %v679_v31 = vpop.f32.mrb[10].mxu0  ;;  %926 = vmatprep.subr.bf16.mxu1 %v881_v25  ;;  %v388_v25 = vpop.permute.xlu0 %387 }
 0x109   : > { %v680_v32 = vadd.f32 %v679_v31, %v353_v29  ;;  %v681_v33 = vpop.f32.mrb[11].mxu0  ;;  %927 = vmatpush1.bf16.msra.mxu1 %v880_v23  ;;  %v822_v35 = vmax.f32 %v676_v27, 0.0 }
 0x10a   : > { %v682_v34 = vadd.f32 %v681_v33, %v353_v29  ;;  %v823_v37 = vmax.f32 %v678_v30, 0.0  ;;  %v393_v30 = vpop.permute.xlu1 %392 }
 0x10b   : > { %v824_v36 = vmax.f32 %v680_v32, 0.0 }
 0x10c   : > { %v825_v38 = vmax.f32 %v682_v34, 0.0 }
 0x10d   : > { %v882_v39 = vpack.c.bf16 %v824_v36, %v822_v35 }
 0x10e   : > { %v883_v41 = vpack.c.bf16 %v825_v38, %v823_v37  ;;  %v685_v42 = vpop.f32.mrb[12].mxu0 }
 0x10f   : > { %v686_v43 = vadd.f32 %v685_v42, %v358_v40  ;;  %v687_v44 = vpop.f32.mrb[13].mxu0 }
 0x110   : > { %v688_v46 = vadd.f32 %v687_v44, %v358_v40  ;;  %v689_v47 = vpop.f32.mrb[14].mxu0  ;;  %928 = vmatprep.subr.bf16.mxu1 %v883_v41  ;;  %v398_v41 = vpop.permute.xlu0 %397 }
 0x111   : > { %v690_v48 = vadd.f32 %v689_v47, %v363_v45  ;;  %v691_v49 = vpop.f32.mrb[15].mxu0  ;;  %929 = vmatpush1.bf16.msra.mxu1 %v882_v39  ;;  %v826_v51 = vmax.f32 %v686_v43, 0.0 }
 0x112   : > { %v692_v50 = vadd.f32 %v691_v49, %v363_v45  ;;  %v827_v53 = vmax.f32 %v688_v46, 0.0  ;;  %v403_v46 = vpop.permute.xlu1 %402 }
 0x113   : > { %v828_v52 = vmax.f32 %v690_v48, 0.0 }
 0x114   : > { %v829_v54 = vmax.f32 %v692_v50, 0.0 }
 0x115   : > { %v884_v55 = vpack.c.bf16 %v828_v52, %v826_v51 }
 0x116   : > { %v885_v57 = vpack.c.bf16 %v829_v54, %v827_v53  ;;  %v695_v58 = vpop.f32.mrb[16].mxu0 }
 0x117   : > { %v696_v59 = vadd.f32 %v695_v58, %v368_v56  ;;  %v697_v60 = vpop.f32.mrb[17].mxu0 }
 0x118   : > { %v698_v63 = vadd.f32 %v697_v60, %v368_v56  ;;  %v699_v0 = vpop.f32.mrb[18].mxu0  ;;  %930 = vmatprep.subr.bf16.mxu1 %v885_v57  ;;  %v408_v57 = vpop.permute.xlu0 %407 }
 0x119   : > { %v700_v1 = vadd.f32 %v699_v0, %v373_v61  ;;  %v701_v2 = vpop.f32.mrb[19].mxu0  ;;  %931 = vmatpush1.bf16.msra.mxu1 %v884_v55  ;;  %v830_v4 = vmax.f32 %v696_v59, 0.0 }
 0x11a   : > { %v702_v3 = vadd.f32 %v701_v2, %v373_v61  ;;  %v831_v6 = vmax.f32 %v698_v63, 0.0  ;;  %v413_v63 = vpop.permute.xlu1 %412 }
 0x11b   : > { %v832_v5 = vmax.f32 %v700_v1, 0.0 }
 0x11c   : > { %v833_v7 = vmax.f32 %v702_v3, 0.0 }
 0x11d   : > { %v886_v8 = vpack.c.bf16 %v832_v5, %v830_v4 }
 0x11e   : > { %v887_v10 = vpack.c.bf16 %v833_v7, %v831_v6  ;;  %v705_v11 = vpop.f32.mrb[20].mxu0 }
 0x11f   : > { %v706_v12 = vadd.f32 %v705_v11, %v378_v9  ;;  %v707_v13 = vpop.f32.mrb[21].mxu0 }
 0x120   : > { %v708_v15 = vadd.f32 %v707_v13, %v378_v9  ;;  %v709_v16 = vpop.f32.mrb[22].mxu0  ;;  %932 = vmatprep.subr.bf16.mxu1 %v887_v10  ;;  %v418_v10 = vpop.permute.xlu0 %417 }
 0x121   : > { %v710_v17 = vadd.f32 %v709_v16, %v383_v14  ;;  %v711_v18 = vpop.f32.mrb[23].mxu0  ;;  %933 = vmatpush1.bf16.msra.mxu1 %v886_v8  ;;  %v834_v20 = vmax.f32 %v706_v12, 0.0 }
 0x122   : > { %v712_v19 = vadd.f32 %v711_v18, %v383_v14  ;;  %v835_v22 = vmax.f32 %v708_v15, 0.0  ;;  %v423_v15 = vpop.permute.xlu1 %422 }
 0x123   : > { %v836_v21 = vmax.f32 %v710_v17, 0.0 }
 0x124   : > { %v837_v23 = vmax.f32 %v712_v19, 0.0 }
 0x125   : > { %v888_v24 = vpack.c.bf16 %v836_v21, %v834_v20 }
 0x126   : > { %v889_v26 = vpack.c.bf16 %v837_v23, %v835_v22  ;;  %v715_v27 = vpop.f32.mrb[24].mxu0 }
 0x127   : > { %v716_v28 = vadd.f32 %v715_v27, %v388_v25  ;;  %v717_v29 = vpop.f32.mrb[25].mxu0 }
 0x128   : > { %v718_v31 = vadd.f32 %v717_v29, %v388_v25  ;;  %v719_v32 = vpop.f32.mrb[26].mxu0  ;;  %934 = vmatprep.subr.bf16.mxu1 %v889_v26  ;;  %v428_v26 = vpop.permute.xlu0 %427 }
 0x129   : > { %v720_v33 = vadd.f32 %v719_v32, %v393_v30  ;;  %v721_v34 = vpop.f32.mrb[27].mxu0  ;;  %935 = vmatpush1.bf16.msra.mxu1 %v888_v24  ;;  %v838_v36 = vmax.f32 %v716_v28, 0.0 }
 0x12a   : > { %v722_v35 = vadd.f32 %v721_v34, %v393_v30  ;;  %v839_v38 = vmax.f32 %v718_v31, 0.0  ;;  %v433_v31 = vpop.permute.xlu1 %432 }
 0x12b   : > { %v840_v37 = vmax.f32 %v720_v33, 0.0 }
 0x12c   : > { %v841_v39 = vmax.f32 %v722_v35, 0.0 }
 0x12d   : > { %v890_v40 = vpack.c.bf16 %v840_v37, %v838_v36 }
 0x12e   : > { %v891_v42 = vpack.c.bf16 %v841_v39, %v839_v38  ;;  %v725_v43 = vpop.f32.mrb[28].mxu0 }
 0x12f   : > { %v726_v44 = vadd.f32 %v725_v43, %v398_v41  ;;  %v727_v45 = vpop.f32.mrb[29].mxu0 }
 0x130   : > { %v728_v47 = vadd.f32 %v727_v45, %v398_v41  ;;  %v729_v48 = vpop.f32.mrb[30].mxu0  ;;  %936 = vmatprep.subr.bf16.mxu1 %v891_v42  ;;  %v438_v42 = vpop.permute.xlu0 %437 }
 0x131   : > { %v730_v49 = vadd.f32 %v729_v48, %v403_v46  ;;  %v731_v50 = vpop.f32.mrb[31].mxu0  ;;  %937 = vmatpush1.bf16.msra.mxu1 %v890_v40  ;;  %v842_v52 = vmax.f32 %v726_v44, 0.0 }
 0x132   : > { %v732_v51 = vadd.f32 %v731_v50, %v403_v46  ;;  %v843_v54 = vmax.f32 %v728_v47, 0.0  ;;  %v443_v47 = vpop.permute.xlu1 %442 }
 0x133   : > { %v844_v53 = vmax.f32 %v730_v49, 0.0 }
 0x134   : > { %v845_v55 = vmax.f32 %v732_v51, 0.0 }
 0x135   : > { %v892_v56 = vpack.c.bf16 %v844_v53, %v842_v52 }
 0x136   : > { %v893_v58 = vpack.c.bf16 %v845_v55, %v843_v54  ;;  %v735_v59 = vpop.f32.mrb[32].mxu0 }
 0x137   : > { %v736_v60 = vadd.f32 %v735_v59, %v408_v57  ;;  %v737_v61 = vpop.f32.mrb[33].mxu0 }
 0x138   : > { %v738_v0 = vadd.f32 %v737_v61, %v408_v57  ;;  %v739_v1 = vpop.f32.mrb[34].mxu0  ;;  %938 = vmatprep.subr.bf16.mxu1 %v893_v58  ;;  %v448_v58 = vpop.permute.xlu0 %447 }
 0x139   : > { %v740_v2 = vadd.f32 %v739_v1, %v413_v63  ;;  %v741_v3 = vpop.f32.mrb[35].mxu0  ;;  %939 = vmatpush1.bf16.msra.mxu1 %v892_v56  ;;  %v846_v5 = vmax.f32 %v736_v60, 0.0 }
 0x13a   : > { %v742_v4 = vadd.f32 %v741_v3, %v413_v63  ;;  %v847_v7 = vmax.f32 %v738_v0, 0.0  ;;  %v453_v0 = vpop.permute.xlu1 %452 }
 0x13b   : > { %v848_v6 = vmax.f32 %v740_v2, 0.0 }
 0x13c   : > { %v849_v8 = vmax.f32 %v742_v4, 0.0 }
 0x13d   : > { %v894_v9 = vpack.c.bf16 %v848_v6, %v846_v5 }
 0x13e   : > { %v895_v11 = vpack.c.bf16 %v849_v8, %v847_v7  ;;  %v745_v12 = vpop.f32.mrb[36].mxu0 }
 0x13f   : > { %v746_v13 = vadd.f32 %v745_v12, %v418_v10  ;;  %v747_v14 = vpop.f32.mrb[37].mxu0 }
 0x140   : > { %v748_v16 = vadd.f32 %v747_v14, %v418_v10  ;;  %v749_v17 = vpop.f32.mrb[38].mxu0  ;;  %940 = vmatprep.subr.bf16.mxu1 %v895_v11  ;;  %v458_v11 = vpop.permute.xlu0 %457 }
 0x141   : > { %v750_v18 = vadd.f32 %v749_v17, %v423_v15  ;;  %v751_v19 = vpop.f32.mrb[39].mxu0  ;;  %941 = vmatpush1.bf16.msra.mxu1 %v894_v9  ;;  %v850_v21 = vmax.f32 %v746_v13, 0.0 }
 0x142   : > { %v752_v20 = vadd.f32 %v751_v19, %v423_v15  ;;  %v851_v23 = vmax.f32 %v748_v16, 0.0  ;;  %v463_v16 = vpop.permute.xlu1 %462 }
 0x143   : > { %v852_v22 = vmax.f32 %v750_v18, 0.0 }
 0x144   : > { %v853_v24 = vmax.f32 %v752_v20, 0.0 }
 0x145   : > { %v896_v25 = vpack.c.bf16 %v852_v22, %v850_v21 }
 0x146   : > { %v897_v27 = vpack.c.bf16 %v853_v24, %v851_v23  ;;  %v755_v28 = vpop.f32.mrb[40].mxu0 }
 0x147   : > { %v756_v29 = vadd.f32 %v755_v28, %v428_v26  ;;  %v757_v30 = vpop.f32.mrb[41].mxu0 }
 0x148   : > { %v758_v32 = vadd.f32 %v757_v30, %v428_v26  ;;  %v759_v33 = vpop.f32.mrb[42].mxu0  ;;  %942 = vmatprep.subr.bf16.mxu1 %v897_v27  ;;  %v468_v27 = vpop.permute.xlu0 %467 }
 0x149   : > { %v760_v34 = vadd.f32 %v759_v33, %v433_v31  ;;  %v761_v35 = vpop.f32.mrb[43].mxu0  ;;  %943 = vmatpush1.bf16.msra.mxu1 %v896_v25  ;;  %v854_v37 = vmax.f32 %v756_v29, 0.0 }
 0x14a   : > { %v762_v36 = vadd.f32 %v761_v35, %v433_v31  ;;  %v855_v39 = vmax.f32 %v758_v32, 0.0  ;;  %v473_v32 = vpop.permute.xlu1 %472 }
 0x14b   : > { %v856_v38 = vmax.f32 %v760_v34, 0.0 }
 0x14c   : > { %v857_v40 = vmax.f32 %v762_v36, 0.0 }
 0x14d   : > { %v898_v41 = vpack.c.bf16 %v856_v38, %v854_v37 }
 0x14e   : > { %v899_v43 = vpack.c.bf16 %v857_v40, %v855_v39  ;;  %v765_v44 = vpop.f32.mrb[44].mxu0 }
 0x14f   : > { %v766_v45 = vadd.f32 %v765_v44, %v438_v42  ;;  %v767_v46 = vpop.f32.mrb[45].mxu0 }
 0x150   : > { %v768_v48 = vadd.f32 %v767_v46, %v438_v42  ;;  %v769_v49 = vpop.f32.mrb[46].mxu0  ;;  %944 = vmatprep.subr.bf16.mxu1 %v899_v43  ;;  %v478_v43 = vpop.permute.xlu0 %477 }
 0x151   : > { %v770_v50 = vadd.f32 %v769_v49, %v443_v47  ;;  %v771_v51 = vpop.f32.mrb[47].mxu0  ;;  %945 = vmatpush1.bf16.msra.mxu1 %v898_v41  ;;  %v858_v53 = vmax.f32 %v766_v45, 0.0 }
 0x152   : > { %v772_v52 = vadd.f32 %v771_v51, %v443_v47  ;;  %v859_v55 = vmax.f32 %v768_v48, 0.0  ;;  %v483_v48 = vpop.permute.xlu1 %482 }
 0x153   : > { %v860_v54 = vmax.f32 %v770_v50, 0.0 }
 0x154   : > { %v861_v56 = vmax.f32 %v772_v52, 0.0 }
 0x155   : > { %v900_v57 = vpack.c.bf16 %v860_v54, %v858_v53 }
 0x156   : > { %v901_v59 = vpack.c.bf16 %v861_v56, %v859_v55  ;;  %v775_v60 = vpop.f32.mrb[48].mxu0 }
 0x157   : > { %v776_v61 = vadd.f32 %v775_v60, %v448_v58  ;;  %v777_v63 = vpop.f32.mrb[49].mxu0  ;;  %v1103_v60 = vcombine.low %v1545_v62, %v1545_v62 }
 0x158   : > { %v778_v1 = vadd.f32 %v777_v63, %v448_v58  ;;  %v779_v2 = vpop.f32.mrb[50].mxu0  ;;  %946 = vmatprep.subr.bf16.mxu1 %v901_v59 }
 0x159   : > { %v780_v3 = vadd.f32 %v779_v2, %v453_v0  ;;  %v781_v4 = vpop.f32.mrb[51].mxu0  ;;  %947 = vmatpush1.bf16.msra.mxu1 %v900_v57  ;;  %v862_v6 = vmax.f32 %v776_v61, 0.0  ;;  %v915_v61 = vpop.permute.xlu0 %914 }
 0x15a   : > { %v782_v5 = vadd.f32 %v781_v4, %v453_v0  ;;  %v863_v8 = vmax.f32 %v778_v1, 0.0 }
 0x15b   : > { %v864_v7 = vmax.f32 %v780_v3, 0.0 }
 0x15c   : > { %v865_v9 = vmax.f32 %v782_v5, 0.0 }
 0x15d   : > { %v902_v10 = vpack.c.bf16 %v864_v7, %v862_v6 }
 0x15e   : > { %v903_v12 = vpack.c.bf16 %v865_v9, %v863_v8  ;;  %v785_v13 = vpop.f32.mrb[52].mxu0 }
 0x15f   : > { %v786_v14 = vadd.f32 %v785_v13, %v458_v11  ;;  %v787_v15 = vpop.f32.mrb[53].mxu0 }
 0x160   : > { %v788_v17 = vadd.f32 %v787_v15, %v458_v11  ;;  %v789_v18 = vpop.f32.mrb[54].mxu0  ;;  %948 = vmatprep.subr.bf16.mxu1 %v903_v12 }
 0x161   : > { %v790_v19 = vadd.f32 %v789_v18, %v463_v16  ;;  %v791_v20 = vpop.f32.mrb[55].mxu0  ;;  %949 = vmatpush1.bf16.msra.mxu1 %v902_v10  ;;  %v866_v22 = vmax.f32 %v786_v14, 0.0 }
 0x162   : > { %v792_v21 = vadd.f32 %v791_v20, %v463_v16  ;;  %v867_v24 = vmax.f32 %v788_v17, 0.0 }
 0x163   : > { %v868_v23 = vmax.f32 %v790_v19, 0.0 }
 0x164   : > { %v869_v25 = vmax.f32 %v792_v21, 0.0 }
 0x165   : > { %v904_v26 = vpack.c.bf16 %v868_v23, %v866_v22 }
 0x166   : > { %v905_v28 = vpack.c.bf16 %v869_v25, %v867_v24  ;;  %v795_v29 = vpop.f32.mrb[56].mxu0 }
 0x167   : > { %v796_v30 = vadd.f32 %v795_v29, %v468_v27  ;;  %v797_v31 = vpop.f32.mrb[57].mxu0 }
 0x168   : > { %v798_v33 = vadd.f32 %v797_v31, %v468_v27  ;;  %v799_v34 = vpop.f32.mrb[58].mxu0  ;;  %950 = vmatprep.subr.bf16.mxu1 %v905_v28 }
 0x169   : > { %v800_v35 = vadd.f32 %v799_v34, %v473_v32  ;;  %v801_v36 = vpop.f32.mrb[59].mxu0  ;;  %951 = vmatpush1.bf16.msra.mxu1 %v904_v26  ;;  %v870_v38 = vmax.f32 %v796_v30, 0.0 }
 0x16a   : > { %v802_v37 = vadd.f32 %v801_v36, %v473_v32  ;;  %v871_v40 = vmax.f32 %v798_v33, 0.0 }
 0x16b   : > { %v872_v39 = vmax.f32 %v800_v35, 0.0 }
 0x16c   : > { %v873_v41 = vmax.f32 %v802_v37, 0.0 }
 0x16d   : > { %v906_v42 = vpack.c.bf16 %v872_v39, %v870_v38 }
 0x16e   : > { %v907_v44 = vpack.c.bf16 %v873_v41, %v871_v40  ;;  %v805_v45 = vpop.f32.mrb[60].mxu0 }
 0x16f   : > { %v806_v46 = vadd.f32 %v805_v45, %v478_v43  ;;  %v807_v47 = vpop.f32.mrb[61].mxu0 }
 0x170   : > { %v808_v49 = vadd.f32 %v807_v47, %v478_v43  ;;  %v809_v50 = vpop.f32.mrb[62].mxu0  ;;  %952 = vmatprep.subr.bf16.mxu1 %v907_v44 }
 0x171   : > { %v810_v51 = vadd.f32 %v809_v50, %v483_v48  ;;  %v811_v52 = vpop.f32.mrb[63].mxu0  ;;  %953 = vmatpush1.bf16.msra.mxu1 %v906_v42  ;;  %v874_v54 = vmax.f32 %v806_v46, 0.0 }
 0x172   : > { %v812_v53 = vadd.f32 %v811_v52, %v483_v48  ;;  %v875_v56 = vmax.f32 %v808_v49, 0.0 }
 0x173   : > { %v876_v55 = vmax.f32 %v810_v51, 0.0 }
 0x174   : > { %v877_v57 = vmax.f32 %v812_v53, 0.0 }
 0x175   : > { %v908_v58 = vpack.c.bf16 %v876_v55, %v874_v54 }
 0x176   : > { %v909_v59 = vpack.c.bf16 %v877_v57, %v875_v56 }
 0x178   : > { %954 = vmatprep.subr.bf16.mxu1 %v909_v59 }
 0x179   : > { %955 = vmatpush1.bf16.msra.mxu1 %v908_v58 }
 0x17c   : > { %957 = vmatmul.mubr.bf16.vlgmr.msra.gmra.mrb[0].mxu1 %v1103_v60 }
 0x24f   : > { %v958_v63 = vpop.f32.mrb[0].mxu1 }
 0x250   : > { %v959_v0 = vadd.f32 %v958_v63, %v915_v61  ;;  %v960_v1 = vpop.f32.mrb[1].mxu1 }
 0x251   : > { %v961_v2 = vadd.f32 %v960_v1, %v915_v61  ;;  %v962_v3 = vpop.f32.mrb[2].mxu1 }
 0x252   : > { %v965_v4 = vmax.f32 %v959_v0, 0.0  ;;  %v963_v5 = vpop.f32.mrb[3].mxu1 }
 0x253   : > { %v966_v6 = vmax.f32 %v961_v2, 0.0 }
 0x254   : > { %967 = vst [vmem:[%s242_s10] sm:$0xff] %v965_v4 }
 0x255   : > { %968 = vst [vmem:[%s242_s10 + $0x8] sm:$0xff] %v966_v6 }
 0x256   : > { %1202 = shalt.err (!%p1199_p5)
}
 0x257   : > { %s1203_s25 = scalar_lea.hbm %s1556_s14, 256  ;;  %s1207_s7 = scalar_lea.hbm %s1608_s5, 512 }
 0x258   : > { %p1204_p6 = scmp.ne.s32.totalorder %s1556_s14, %s1203_s25  ;;  %p1208_p10 = scmp.lt.u32.totalorder %s1556_s14, %s1608_s5 }
 0x259   : > { %p1209_p11 = scmp.lt.u32.totalorder %s1207_s7, %s1203_s25  ;;  %p1211_p13 = scmp.lt.u32.totalorder %s1203_s25, %s1556_s14 }
 0x25a   : > { %p1205_p7 = pnand %p1204_p6, %p1341_p4 }
 0x25b   : > { %p1210_p12 = por %p1209_p11, %p1208_p10 }
 0x25c   : > { %p1206_p9 = pneg %p1205_p7 }
 0x25d   : > { %p1212_p0 = por %p1211_p13, %p1210_p12 }
 0x25f   : > { %p1213_p1 = pnand %p1212_p0, %p1206_p9 }
 0x261   : > { %1216 = shalt.err (!%p1213_p1)
}
 0x262   : > { %1112 = dma.vmem_to_hbm [thread:$0]  (%p1341_p4), %s1558_s11, 256, %s1556_s14, %s970_s21  }
 0x263 PF: > { %p1118_p2 = scmp.ge.s32.totalorder %s1267_s23, 2  ;;  %s998_s10 = sand.u32 1, %s1247_s18  }
 0x264   : > { %s999_s12 = scalar_lea.sflag [#allocation3], %s998_s10 }
 0x265   : > { %p1115_p3 = pnand %p1118_p2, %p1348_p8 }
 0x267   : > { %1242 = dma.done.wait (!%p1115_p3), %s999_s12, 256  }
 0x268   : > { %1244 = vsyncadd (!%p1115_p3), %s999_s12, 4294967040  ;;  %s18_s23 = sadd.s32 1, %s1267_s23   ;;  %s1611_s18 = smov %s1251_s19 }
 0x269   : > { %p15_p5 = scmp.ge.s32.totalorder %s18_s23, 4   ;;  %s1612_s19 = smov %s1255_s20 }
 0x26a   : > { %s1613_s20 = smov %s1354_s6  ;;  %s1614_s21 = smov %s1263_s22 }
 0x26b   : > { %s1615_s22 = smov %s1617_s26  ;;  %17 = sbr.rel (!%p15_p5) target bundleno = 4 (0x4), region = 75 }
 0x272   :  { %1004 = vsyncpa [#allocation3], 1 }
 0x273   :  { %1006 = vsyncpa [#allocation3 + $0x1], 1 }

</bundles_post_ra>
